<compile_context>
chip_gen: v7x
topology: tpu7x:2x2x1
jax: 0.10.0
libtpu: 0.0.40
codegen_flags: <defaults>
</compile_context>

<pallas_src>
import functools

import jax
import jax.numpy as jnp
from jax.experimental import pallas as pl
from jax.experimental.pallas import tpu as pltpu


def _rmsnorm_kernel(x_ref, w_ref, o_ref, *, eps, inv_dim):
    # x_ref: (tile_rows, dim), w_ref: (1, dim), o_ref: (tile_rows, dim)
    # Mean of squares over the feature (lane) axis; sum * (1/dim) avoids an
    # extra materialized f32 temp.
    xf = x_ref[...].astype(jnp.float32)
    ms = jnp.sum(xf * xf, axis=-1, keepdims=True) * inv_dim
    # Re-read + re-cast x instead of holding the first f32 upcast live across
    # the lane reduction (keeps the live-f32 footprint at ~1-2 blocks).
    xf = x_ref[...].astype(jnp.float32)
    # Match torch: `self._norm(x.float()).type_as(x) * self.weight`
    normed = (xf * jax.lax.rsqrt(ms + eps)).astype(x_ref.dtype)
    o_ref[...] = (normed * w_ref[...]).astype(o_ref.dtype)


def _sublane_pack(dtype) -> int:
    # Rows per packed sublane group: 8 for 4-byte, 16 for 2-byte, 32 for 1-byte.
    itemsize = jnp.dtype(dtype).itemsize
    return max(8, 32 // max(itemsize, 1))


def _tpu_hw_params():
    """Return (vmem_cap_bytes, num_tensorcores, per_block_f32_byte_target)."""
    kind = ""
    try:
        kind = (jax.devices()[0].device_kind or "").lower()
    except Exception:
        pass

    vmem_cap = 64 << 20  # conservative default (v7x per-TC VMEM)
    try:
        info = pltpu.get_tpu_info()
        cap = int(getattr(info, "vmem_capacity_bytes", 0) or 0)
        if cap > 0:
            vmem_cap = cap
    except Exception:
        pass

    if "v7" in kind:
        # 2 TCs share the grid via "parallel"; ~3.2 TB/s HBM -> bigger tiles
        # amortize the ~0.35 us per-grid-step overhead.
        cores, target = 2, 8 << 20
    elif "v6" in kind:
        cores, target = 1, 8 << 20
        vmem_cap = max(vmem_cap, 128 << 20)
    elif "v5p" in kind or "v4" in kind:
        cores, target = 2, 4 << 20  # megacore chips
        vmem_cap = max(vmem_cap, 128 << 20)
    elif "v5" in kind:  # v5e / v5 lite: single TC, slower HBM
        cores, target = 1, 4 << 20
        vmem_cap = max(vmem_cap, 128 << 20)
    else:
        cores, target = 1, 4 << 20
    return vmem_cap, cores, target


def _choose_tile_rows(rows, dim, pack, target_f32_bytes, num_cores):
    """Largest sublane-aligned row tile under the per-block f32 byte target."""
    if rows <= pack:
        return rows  # one block covering the full array (full-array dims are OK)
    max_tile = max(pack, (target_f32_bytes // (dim * 4)) // pack * pack)
    tile = min(max_tile, (rows // pack) * pack)
    # Only split a fits-in-one-block input when there are >= 2 TensorCores to
    # feed; on single-TC chips the extra grid step is pure per-step overhead.
    if num_cores >= 2 and tile >= rows and rows >= 2 * pack:
        half = -(-rows // 2)                       # ceil(rows / 2)
        tile = min(-(-half // pack) * pack,        # round half up to pack
                   (rows // pack) * pack)
    tile = max(tile, pack)
    # Small odd grids leave one core idle for a whole block on 2-TC chips;
    # nudge the step count to even (no effect at large grids).
    steps = -(-rows // tile)
    if num_cores >= 2 and 1 < steps < 16 and steps % 2 == 1:
        per_step = -(-rows // (steps + 1))
        tile = max(pack, -(-per_step // pack) * pack)
    return tile


def rmsnorm(x, weight, eps=1e-5, out_dtype=None):
    """RMSNorm over the last axis of x, scaled by `weight` (shape (dim,)).

    out_dtype=None keeps torch promotion (e.g. bf16 x * f32 weight -> f32 out).
    Pass out_dtype=x.dtype to skip the f32 writeback for low-precision inputs
    (~1.4x less HBM traffic for bf16); in-kernel math is unchanged.
    """
    orig_shape = x.shape
    dim = orig_shape[-1]
    rows = 1
    for s in orig_shape[:-1]:
        rows *= s
    x2 = x.reshape(rows, dim)
    w2 = weight.reshape(1, dim)

    if out_dtype is None:
        out_dtype = jnp.result_type(x.dtype, weight.dtype)

    vmem_cap, num_cores, target_f32 = _tpu_hw_params()
    pack = _sublane_pack(x.dtype)
    tile_rows = _choose_tile_rows(rows, dim, pack, target_f32, num_cores)
    grid = (pl.cdiv(rows, tile_rows),)

    # VMEM budget: double-buffered in/out blocks + weight + ~2 live f32 blocks.
    in_block = tile_rows * dim * jnp.dtype(x.dtype).itemsize
    out_block = tile_rows * dim * jnp.dtype(out_dtype).itemsize
    f32_block = tile_rows * dim * 4
    w_bytes = dim * jnp.dtype(weight.dtype).itemsize
    vmem_est = 2 * (in_block + out_block) + 2 * w_bytes + 2 * f32_block + (2 << 20)
    vmem_ceiling = max(16 << 20, min(vmem_cap - (8 << 20), 100 << 20))
    vmem_limit = int(min(max(vmem_est, 16 << 20), vmem_ceiling))

    out = pl.pallas_call(
        functools.partial(_rmsnorm_kernel, eps=eps, inv_dim=1.0 / dim),
        out_shape=jax.ShapeDtypeStruct((rows, dim), out_dtype),
        grid_spec=pltpu.PrefetchScalarGridSpec(
            num_scalar_prefetch=0,
            grid=grid,
            in_specs=[
                pl.BlockSpec((tile_rows, dim), lambda i: (i, 0)),
                # Constant block index -> the weight is DMA'd only once.
                pl.BlockSpec((1, dim), lambda i: (0, 0)),
            ],
            out_specs=pl.BlockSpec((tile_rows, dim), lambda i: (i, 0)),
        ),
        compiler_params=pltpu.CompilerParams(
            dimension_semantics=("parallel",),
            vmem_limit_bytes=vmem_limit,
        ),
    )(x2, w2)

    # TODO(synk): for dim < 128 (e.g. this module's dim=32 test shape) a
    # lane-dense layout (fold 128//dim rows into the lane axis + a segmented
    # lane reduction) would avoid masked vst.msk partial stores; production
    # call sites should keep dim a multiple of 128 so stores are lane-dense.
    return out.reshape(orig_shape)


def rmsnorm_reference(x, weight, eps=1e-5):
    xf = x.astype(jnp.float32)
    ms = jnp.mean(xf * xf, axis=-1, keepdims=True)
    normed = (xf * jax.lax.rsqrt(ms + eps)).astype(x.dtype)
    return normed * weight


if __name__ == "__main__":
    key = jax.random.PRNGKey(0)
    batch, seq, dim = 2, 8, 32  # small shapes consistent with the module
    x = jax.random.normal(key, (batch, seq, dim), dtype=jnp.float32)

    # deterministic parameter init: nn.Parameter(torch.ones(dim))
    weight = jnp.ones((dim,), dtype=jnp.float32)

    # Default path: exact torch promotion semantics.
    out = rmsnorm(x, weight, eps=1e-5)
    out = jax.block_until_ready(out)
    ref = rmsnorm_reference(x, weight, eps=1e-5)
    assert out.shape == x.shape
    assert out.dtype == jnp.result_type(x.dtype, weight.dtype)
    assert jnp.allclose(out, ref, atol=1e-5, rtol=1e-5)

    # Opt-in low-precision output path (skips the f32 writeback for bf16 x).
    xb = x.astype(jnp.bfloat16)
    out_b = jax.block_until_ready(
        rmsnorm(xb, weight, eps=1e-5, out_dtype=jnp.bfloat16))
    ref_b = rmsnorm_reference(xb, weight, eps=1e-5).astype(jnp.bfloat16)
    assert out_b.shape == xb.shape
    assert out_b.dtype == jnp.bfloat16
    assert jnp.allclose(out_b.astype(jnp.float32), ref_b.astype(jnp.float32),
                        atol=2e-2, rtol=2e-2)

    print("KERNEL_OK")
</pallas_src>

<mosaic_0001>
module attributes {stable_mosaic.version = 11 : i64} {
  func.func @_rmsnorm_kernel(%arg0: i32, %arg1: memref<16x32xf32, #tpu.memory_space<vmem>>, %arg2: memref<1x32xf32, #tpu.memory_space<vmem>>, %arg3: memref<16x32xf32, #tpu.memory_space<vmem>>) attributes {dimension_semantics = [#tpu.dimension_semantics<parallel>], iteration_bounds = array<i64: 1>, scalar_prefetch = 0 : i64, scratch_operands = 0 : i64, tpu.core_type = #tpu.core_type<tc>, window_params = [{transform_indices = @transform_0, window_bounds = array<i64: 16, 32>}, {pipeline_mode = #tpu.pipeline_mode<synchronous>, transform_indices = @transform_1, window_bounds = array<i64: 1, 32>}, {transform_indices = @transform_2, window_bounds = array<i64: 16, 32>}]} {
    %c0 = arith.constant 0 : index
    %c0_0 = arith.constant 0 : index
    %0 = vector.load %arg1[%c0, %c0_0] : memref<16x32xf32, #tpu.memory_space<vmem>>, vector<16x32xf32>
    %1 = arith.mulf %0, %0 : vector<16x32xf32>
    %cst = arith.constant dense<0.000000e+00> : vector<16xf32>
    %2 = vector.multi_reduction <add>, %1, %cst [1] : vector<16x32xf32> to vector<16xf32>
    %3 = vector.shape_cast %2 : vector<16xf32> to vector<16x1xf32>
    %cst_1 = arith.constant 3.125000e-02 : f32
    %4 = vector.broadcast %cst_1 : f32 to vector<16x1xf32>
    %5 = arith.mulf %3, %4 : vector<16x1xf32>
    %c0_2 = arith.constant 0 : index
    %c0_3 = arith.constant 0 : index
    %6 = vector.load %arg1[%c0_2, %c0_3] : memref<16x32xf32, #tpu.memory_space<vmem>>, vector<16x32xf32>
    %cst_4 = arith.constant 9.99999974E-6 : f32
    %7 = vector.broadcast %cst_4 : f32 to vector<16x1xf32>
    %8 = arith.addf %5, %7 : vector<16x1xf32>
    %9 = math.rsqrt %8 : vector<16x1xf32>
    %10 = vector.broadcast %9 : vector<16x1xf32> to vector<16x32xf32>
    %11 = arith.mulf %6, %10 : vector<16x32xf32>
    %c0_5 = arith.constant 0 : index
    %c0_6 = arith.constant 0 : index
    %12 = vector.load %arg2[%c0_5, %c0_6] : memref<1x32xf32, #tpu.memory_space<vmem>>, vector<1x32xf32>
    %13 = vector.broadcast %12 : vector<1x32xf32> to vector<16x32xf32>
    %14 = arith.mulf %11, %13 : vector<16x32xf32>
    %c0_7 = arith.constant 0 : index
    %c0_8 = arith.constant 0 : index
    %15 = vector.load %arg3[%c0_7, %c0_8] : memref<16x32xf32, #tpu.memory_space<vmem>>, vector<16x32xf32>
    tpu.vector_store %arg3[%c0_7, %c0_8], %14 {strides = array<i32>} : memref<16x32xf32, #tpu.memory_space<vmem>>, vector<16x32xf32>,
    return
  }
  func.func @transform_0(%arg0: i32) -> (i32, i32) {
    %c0_i32 = arith.constant 0 : i32
    %c0_i32_0 = arith.constant 0 : i32
    return %arg0, %c0_i32 : i32, i32
  }
  func.func @transform_1(%arg0: i32) -> (i32, i32) {
    %c0_i32 = arith.constant 0 : i32
    %c0_i32_0 = arith.constant 0 : i32
    %c0_i32_1 = arith.constant 0 : i32
    return %c0_i32, %c0_i32_0 : i32, i32
  }
  func.func @transform_2(%arg0: i32) -> (i32, i32) {
    %c0_i32 = arith.constant 0 : i32
    %c0_i32_0 = arith.constant 0 : i32
    return %arg0, %c0_i32 : i32, i32
  }
}

</mosaic_0001>

<bundles_post_ra>
// kernel: tpu_custom_call.1
= control target key start
LH: loop header
LB: loop body
LE: loop exit
PB: predicated region body
PF: predicated region fallthrough
CT: control target
= control target key end

     0   :  { %7 = vsyncpa [#allocation3], 0  ;;  %s186_s0 = inlined_call_operand.hbm [shape: f32[16,32], index: 0, kind: input, shape index: {}]   ;;  %s187_s1 = inlined_call_operand.vmem [shape: f32[1,32], index: 1, kind: input, shape index: {}]   ;;  %s188_s2 = inlined_call_operand.hbm [shape: f32[16,32], index: 2, kind: output, shape index: {}]  }
   0x1   :  { %8 = vsyncpa [#allocation4], 0  ;;  %s130_s9 = smov [#allocation2]   ;;  %s82_s13 = scalar_lea.hbm %s186_s0, 256 }
   0x2   :  { %s14_s10 = sshll.u32 %s130_s9, 4  ;;  %p83_p0 = scmp.ne.s32.totalorder %s186_s0, %s82_s13  ;;  %s15_s10 = int_to_ptr.vmem [resolvable:$true] %s14_s10 }
   0x3   :  { %p86_p1 = scmp.lt.u32.totalorder %s82_s13, %s186_s0 }
   0x5   :  { %p88_p2 = pnand %p86_p1, %p83_p0 }
   0x7   :  { %91 = shalt.err (!%p88_p2)
}
   0x8   :  { %s92_s18 = scalar_lea.vmem %s15_s10, 256  ;;  %p97_p4 = scmp.lt.s32.totalorder %s15_s10, %s15_s10 }
   0x9   :  { %p93_p3 = scmp.ne.s32.totalorder %s15_s10, %s92_s18  ;;  %p98_p5 = scmp.lt.s32.totalorder %s92_s18, %s92_s18 }
   0xb   :  { %p99_p6 = por %p98_p5, %p97_p4 }
   0xd   :  { %p100_p7 = pnand %p99_p6, %p93_p3 }
   0xf   :  { %103 = shalt.err (!%p100_p7)
}
  0x10   :  { %s131_s19 = smov 128   ;;  %s132_s20 = smov 8  }
  0x11   :  { %20 = dma.hbm_to_vmem [thread:$0]  %s186_s0, 256, %s15_s10, [#allocation3], %s131_s19, %s131_s19, %s132_s20  }
  0x12   :  { %126 = dma.done.wait [#allocation3], 256  }
  0x13   :  { %127 = vsyncadd [#allocation3], 4294967040  ;;  %v26_v0 = vld [vmem:[#allocation2] sm:$0xff]  ;;  %vm30_vm0 = vcmask 261120   ;;  %v27_v1 = vld [vmem:[#allocation2 + $0x8] sm:$0xff]  ;;  %s133_s24 = smov [#allocation5]  }
  0x14   :  { %v28_v2 = vmul.f32 %v26_v0, %v26_v0  ;;  %v29_v3 = vmul.f32 %v27_v1, %v27_v1  ;;  %v73_v13 = vld [vmem:[%s187_s1] ss:$0 sm:$0xff]  ;;  %s61_s25 = sshll.u32 %s133_s24, 4  ;;  %s62_s25 = int_to_ptr.vmem [resolvable:$true] %s61_s25 }
  0x15   :  { %s104_s26 = scalar_lea.vmem %s62_s25, 256  ;;  %p109_p9 = scmp.lt.s32.totalorder %s62_s25, %s62_s25 }
  0x16   :  { %v31_v4 = vsel %vm30_vm0, %v28_v2, 0.0  ;;  %v34_v5 = vsel %vm30_vm0, %v29_v3, 0.0  ;;  %p105_p8 = scmp.ne.s32.totalorder %s62_s25, %s104_s26  ;;  %p110_p10 = scmp.lt.s32.totalorder %s104_s26, %s104_s26 }
  0x17   :  { %32 = vadd.xlane.f32.xlu0 %v31_v4 }
  0x18   :  { %p111_p11 = por %p110_p10, %p109_p9 }
  0x1a   :  { %p112_p12 = pnand %p111_p11, %p105_p8 }
  0x1b   :  { %35 = vadd.xlane.f32.xlu0 %v34_v5 }
  0xa4   :  { %v33_v6 = vpop.xlane.xlu0 %32 }
  0xa5   :  { %v37_v7 = vmul.f32 0.03125, %v33_v6 }
  0xa7   :  { %v39_v8 = vadd.f32 1e-05, %v37_v7 }
  0xa8   :  { %v36_v9 = vpop.xlane.xlu0 %35 }
  0xa9   :  { %78 = vrsqrt.f32 %v39_v8  ;;  %v38_v10 = vmul.f32 0.03125, %v36_v9 }
  0xab   :  { %v40_v11 = vadd.f32 1e-05, %v38_v10 }
  0xad   :  { %80 = vrsqrt.f32 %v40_v11 }
  0xb3   :  { %v79_v12 = vpop.eup %78 }
  0xb4   :  { %v43_v14 = vmul.f32 %v79_v12, %v26_v0 }
  0xb6   :  { %v52_v15 = vmul.f32 %v73_v13, %v43_v14 }
  0xb7   :  { %v81_v16 = vpop.eup %80 }
  0xb8   :  { %v44_v17 = vmul.f32 %v81_v16, %v27_v1  ;;  %54 = vst.msk [vmem:[#allocation5] sm:$0xff] %vm30_vm0, %v52_v15 }
  0xba   :  { %v53_v18 = vmul.f32 %v73_v13, %v44_v17 }
  0xbc   :  { %55 = vst.msk [vmem:[#allocation5 + $0x8] sm:$0xff] %vm30_vm0, %v53_v18 }
  0xbd   :  { %115 = shalt.err (!%p112_p12)
}
  0xbe   :  { %s116_s28 = scalar_lea.hbm %s188_s2, 256 }
  0xbf   :  { %p117_p13 = scmp.ne.s32.totalorder %s188_s2, %s116_s28  ;;  %p120_p0 = scmp.lt.u32.totalorder %s116_s28, %s188_s2 }
  0xc1   :  { %p122_p1 = pnand %p120_p0, %p117_p13 }
  0xc3   :  { %125 = shalt.err (!%p122_p1)
}
  0xc4   :  { %67 = dma.vmem_to_hbm [thread:$0]  %s62_s25, 256, %s188_s2, [#allocation4], %s131_s19, %s131_s19, %s132_s20  }
  0xc5   :  { %128 = dma.done.wait [#allocation4], 256  }
  0xc6   :  { %129 = vsyncadd [#allocation4], 4294967040 }
  0xc7   :  { %71 = vsyncpa [#allocation3], 1 }
  0xc8   :  { %72 = vsyncpa [#allocation4], 1 }

</bundles_post_ra>
